<compile_context>
chip_gen: v5e
topology: v5e:2x2
jax: 0.10.0
libtpu: 0.0.40
codegen_flags: <defaults>
</compile_context>

<pallas_src>
import functools

import jax
import jax.numpy as jnp
from jax.experimental import pallas as pl
from jax.experimental.pallas import tpu as pltpu


# -----------------------------------------------------------------------------
# Kernel
# -----------------------------------------------------------------------------
def _critic_kernel(x_ref, u_ref, wx_ref, wu_ref, ba_ref, wb_ref, bb_ref,
                   wct_ref, bc_ref, qt_ref):
    """One batch tile of the fused twin-Q critic.

      h  = relu(x @ Wx + u @ Wu + ba)        (== relu(cat[x,u] @ [W1|W4] + ba))
      h  = relu(h @ Wb + bb)                 Wb = blockdiag(W2, W5)
      qT = WcT @ h^T + bc                    WcT = blockdiag(W3, W6)^T -> [2, TB]

    MXU operands are bf16 (cast in-kernel); accumulation, bias add and ReLU
    are f32. Output is lane-dense: batch lives in the lane dimension.
    """
    cdt = wx_ref.dtype
    x = x_ref[...].astype(cdt)
    u = u_ref[...].astype(cdt)

    h = (jnp.dot(x, wx_ref[...], preferred_element_type=jnp.float32)
         + jnp.dot(u, wu_ref[...], preferred_element_type=jnp.float32)
         + ba_ref[...])
    h = jnp.maximum(h, 0.0)

    h = jnp.dot(h.astype(cdt), wb_ref[...],
                preferred_element_type=jnp.float32) + bb_ref[...]
    h = jnp.maximum(h, 0.0)

    # q^T[j, b] = sum_k WcT[j, k] * h[b, k]  -> [2, TB]  (lane-dense store)
    qt = jax.lax.dot_general(
        wct_ref[...], h.astype(cdt),
        dimension_numbers=(((1,), (1,)), ((), ())),
        preferred_element_type=jnp.float32)
    qt_ref[...] = qt + bc_ref[...]


# -----------------------------------------------------------------------------
# Parameter prep (one-time; hoisted out of the forward path)
# -----------------------------------------------------------------------------
def _round_up(x, m):
    return ((x + m - 1) // m) * m


def _block_diag(a, b):
    za = jnp.zeros((a.shape[0], b.shape[1]), a.dtype)
    zb = jnp.zeros((b.shape[0], a.shape[1]), b.dtype)
    return jnp.concatenate(
        [jnp.concatenate([a, za], axis=1),
         jnp.concatenate([zb, b], axis=1)], axis=0)


def prepare_critic_params(params, state_dim, compute_dtype=jnp.bfloat16):
    """Fuse the two Q heads once and cast weights to the MXU compute dtype.

    params = (w1, b1, ..., w6, b6); weights [in, out], biases [1, out], f32.
    Returns (wx, wu, ba, wb, bb, wct, bc):
      wx  [S, 2h] bf16     wu  [A, 2h] bf16     ba [1, 2h] f32
      wb  [2h, 2h] bf16    bb  [1, 2h] f32
      wct [2, 2h] bf16     bc  [2, 1]  f32
    """
    (w1, b1, w2, b2, w3, b3, w4, b4, w5, b5, w6, b6) = params
    wa = jnp.concatenate([w1, w4], axis=1)                 # [S+A, 2h]
    wx = wa[:state_dim].astype(compute_dtype)              # [S, 2h]
    wu = wa[state_dim:].astype(compute_dtype)              # [A, 2h]
    ba = jnp.concatenate([b1, b4], axis=1)                 # [1, 2h] f32
    wb = _block_diag(w2, w5).astype(compute_dtype)         # [2h, 2h]
    bb = jnp.concatenate([b2, b5], axis=1)                 # [1, 2h] f32
    wct = _block_diag(w3, w6).T.astype(compute_dtype)      # [2, 2h]
    bc = jnp.concatenate([b3, b6], axis=0)                 # [2, 1] f32
    return (wx, wu, ba, wb, bb, wct, bc)


# -----------------------------------------------------------------------------
# Forward
# -----------------------------------------------------------------------------
def _choose_tile(batch, block_b):
    """Batch tile: huge steps (overhead-bound kernel), >=2 steps for big B."""
    block_b = max(128, (block_b // 128) * 128)     # lane-dense output needs %128
    if batch <= 512:
        return batch                               # single step, no padding
    # >=2 grid steps so both v7x TensorCores get work; each step stays large.
    return min(block_b, _round_up(pl.cdiv(batch, 2), 128))


def critic_forward(x, u, prepared_params, *, block_b=2048):
    """TD3 Critic forward. Returns (q1, q2), each [B, 1] float32.

    `prepared_params` comes from `prepare_critic_params` (call once, reuse).
    """
    (wx, wu, ba, wb, bb, wct, bc) = prepared_params
    B, S = x.shape
    A = u.shape[1]
    H2 = wx.shape[1]            # 2 * h_dim

    tb = _choose_tile(B, block_b)
    grid = (pl.cdiv(B, tb),)
    resident = lambda i: (0, 0)  # weights/biases stay in VMEM across all steps

    qt = pl.pallas_call(
        _critic_kernel,
        out_shape=jax.ShapeDtypeStruct((2, B), jnp.float32),
        grid=grid,
        in_specs=[
            pl.BlockSpec((tb, S), lambda i: (i, 0)),   # x tile (f32, cast in-kernel)
            pl.BlockSpec((tb, A), lambda i: (i, 0)),   # u tile
            pl.BlockSpec((S, H2), resident),           # Wx
            pl.BlockSpec((A, H2), resident),           # Wu
            pl.BlockSpec((1, H2), resident),           # ba
            pl.BlockSpec((H2, H2), resident),          # Wb
            pl.BlockSpec((1, H2), resident),           # bb
            pl.BlockSpec((2, H2), resident),           # WcT
            pl.BlockSpec((2, 1), resident),            # bc
        ],
        out_specs=pl.BlockSpec((2, tb), lambda i: (0, i)),   # lane-dense q^T
        compiler_params=pltpu.CompilerParams(
            dimension_semantics=("parallel",)),
    )(x, u, wx, wu, ba, wb, bb, wct, bc)

    q1 = qt[0].reshape(B, 1)
    q2 = qt[1].reshape(B, 1)
    return q1, q2


# -----------------------------------------------------------------------------
# Init + references
# -----------------------------------------------------------------------------
def init_critic_params(key, state_dim, action_dim, h_dim):
    """PyTorch nn.Linear default init: U(-1/sqrt(fan_in), +1/sqrt(fan_in))."""
    ks = jax.random.split(key, 12)

    def linear(kw, kb, fan_in, fan_out):
        bound = 1.0 / float(fan_in) ** 0.5
        w = jax.random.uniform(kw, (fan_in, fan_out), jnp.float32, -bound, bound)
        b = jax.random.uniform(kb, (1, fan_out), jnp.float32, -bound, bound)
        return w, b

    in_dim = state_dim + action_dim
    w1, b1 = linear(ks[0], ks[1], in_dim, h_dim)
    w2, b2 = linear(ks[2], ks[3], h_dim, h_dim)
    w3, b3 = linear(ks[4], ks[5], h_dim, 1)
    w4, b4 = linear(ks[6], ks[7], in_dim, h_dim)
    w5, b5 = linear(ks[8], ks[9], h_dim, h_dim)
    w6, b6 = linear(ks[10], ks[11], h_dim, 1)
    return (w1, b1, w2, b2, w3, b3, w4, b4, w5, b5, w6, b6)


def critic_forward_ref_f32(x, u, params):
    """Pure f32 reference matching the PyTorch module exactly."""
    (w1, b1, w2, b2, w3, b3, w4, b4, w5, b5, w6, b6) = params
    xu = jnp.concatenate([x, u], axis=1)
    h1 = jax.nn.relu(xu @ w1 + b1)
    h1 = jax.nn.relu(h1 @ w2 + b2)
    q1 = h1 @ w3 + b3
    h2 = jax.nn.relu(xu @ w4 + b4)
    h2 = jax.nn.relu(h2 @ w5 + b5)
    q2 = h2 @ w6 + b6
    return q1, q2


def critic_forward_ref_mixed(x, u, params, compute_dtype=jnp.bfloat16):
    """Mirrors the kernel numerics: bf16 matmul operands, f32 accumulation."""
    (w1, b1, w2, b2, w3, b3, w4, b4, w5, b5, w6, b6) = params
    hi = jax.lax.Precision.HIGHEST

    def mm(a, w):
        a = a.astype(compute_dtype).astype(jnp.float32)
        w = w.astype(compute_dtype).astype(jnp.float32)
        return jnp.dot(a, w, precision=hi)

    xu = jnp.concatenate([x, u], axis=1)
    h1 = jax.nn.relu(mm(xu, w1) + b1)
    h1 = jax.nn.relu(mm(h1, w2) + b2)
    q1 = mm(h1, w3) + b3
    h2 = jax.nn.relu(mm(xu, w4) + b4)
    h2 = jax.nn.relu(mm(h2, w5) + b5)
    q2 = mm(h2, w6) + b6
    return q1, q2


# -----------------------------------------------------------------------------
# Self-test
# -----------------------------------------------------------------------------
if __name__ == "__main__":
    key = jax.random.PRNGKey(0)
    k_params, k_x, k_u = jax.random.split(key, 3)

    batch, state_dim, action_dim, h_dim = 96, 16, 7, 10   # module default h_dim=10
    params = init_critic_params(k_params, state_dim, action_dim, h_dim)
    prepared = prepare_critic_params(params, state_dim)    # one-time prep
    x = jax.random.normal(k_x, (batch, state_dim), jnp.float32)
    u = jax.random.normal(k_u, (batch, action_dim), jnp.float32)

    fwd = jax.jit(functools.partial(critic_forward, block_b=2048))
    q1, q2 = fwd(x, u, prepared)
    (q1, q2) = jax.block_until_ready((q1, q2))
    assert q1.shape == (batch, 1) and q2.shape == (batch, 1)

    # Tight check vs a reference that uses identical bf16-operand / f32-acc math.
    r1m, r2m = critic_forward_ref_mixed(x, u, params)
    assert jnp.allclose(q1, r1m, atol=1e-4, rtol=1e-4), "mismatch vs mixed-precision reference"
    assert jnp.allclose(q2, r2m, atol=1e-4, rtol=1e-4), "mismatch vs mixed-precision reference"

    # Loose check vs the pure-f32 PyTorch-equivalent forward (bf16 rounding only).
    r1, r2 = critic_forward_ref_f32(x, u, params)
    assert jnp.allclose(q1, r1, atol=5e-2, rtol=5e-2), "mismatch vs f32 reference"
    assert jnp.allclose(q2, r2, atol=5e-2, rtol=5e-2), "mismatch vs f32 reference"

    print("KERNEL_OK")
</pallas_src>

<mosaic_0001>
module attributes {stable_mosaic.version = 11 : i64} {
  func.func @_critic_kernel(%arg0: i32, %arg1: memref<96x16xf32, #tpu.memory_space<vmem>>, %arg2: memref<96x7xf32, #tpu.memory_space<vmem>>, %arg3: memref<16x20xbf16, #tpu.memory_space<vmem>>, %arg4: memref<7x20xbf16, #tpu.memory_space<vmem>>, %arg5: memref<1x20xf32, #tpu.memory_space<vmem>>, %arg6: memref<20x20xbf16, #tpu.memory_space<vmem>>, %arg7: memref<1x20xf32, #tpu.memory_space<vmem>>, %arg8: memref<2x20xbf16, #tpu.memory_space<vmem>>, %arg9: memref<2x1xf32, #tpu.memory_space<vmem>>, %arg10: memref<2x96xf32, #tpu.memory_space<vmem>>) attributes {dimension_semantics = [#tpu.dimension_semantics<parallel>], iteration_bounds = array<i64: 1>, scalar_prefetch = 0 : i64, scratch_operands = 0 : i64, tpu.core_type = #tpu.core_type<tc>, window_params = [{transform_indices = @transform_0, window_bounds = array<i64: 96, 16>}, {transform_indices = @transform_1, window_bounds = array<i64: 96, 7>}, {pipeline_mode = #tpu.pipeline_mode<synchronous>, transform_indices = @transform_2, window_bounds = array<i64: 16, 20>}, {pipeline_mode = #tpu.pipeline_mode<synchronous>, transform_indices = @transform_3, window_bounds = array<i64: 7, 20>}, {pipeline_mode = #tpu.pipeline_mode<synchronous>, transform_indices = @transform_4, window_bounds = array<i64: 1, 20>}, {pipeline_mode = #tpu.pipeline_mode<synchronous>, transform_indices = @transform_5, window_bounds = array<i64: 20, 20>}, {pipeline_mode = #tpu.pipeline_mode<synchronous>, transform_indices = @transform_6, window_bounds = array<i64: 1, 20>}, {pipeline_mode = #tpu.pipeline_mode<synchronous>, transform_indices = @transform_7, window_bounds = array<i64: 2, 20>}, {pipeline_mode = #tpu.pipeline_mode<synchronous>, transform_indices = @transform_8, window_bounds = array<i64: 2, 1>}, {transform_indices = @transform_9, window_bounds = array<i64: 2, 96>}]} {
    %c0 = arith.constant 0 : index
    %c0_0 = arith.constant 0 : index
    %0 = vector.load %arg1[%c0, %c0_0] : memref<96x16xf32, #tpu.memory_space<vmem>>, vector<96x16xf32>
    %1 = arith.truncf %0 : vector<96x16xf32> to vector<96x16xbf16>
    %c0_1 = arith.constant 0 : index
    %c0_2 = arith.constant 0 : index
    %2 = vector.load %arg2[%c0_1, %c0_2] : memref<96x7xf32, #tpu.memory_space<vmem>>, vector<96x7xf32>
    %3 = arith.truncf %2 : vector<96x7xf32> to vector<96x7xbf16>
    %c0_3 = arith.constant 0 : index
    %c0_4 = arith.constant 0 : index
    %4 = vector.load %arg3[%c0_3, %c0_4] : memref<16x20xbf16, #tpu.memory_space<vmem>>, vector<16x20xbf16>
    %cst = arith.constant dense<0.000000e+00> : vector<96x20xf32>
    %5 = tpu.matmul %1, %4, %cst {dimension_numbers = #tpu.dot_dimension_numbers<[1], [0], [0], [1], [0, 0, 1, 1], [], []>} : vector<96x16xbf16>, vector<16x20xbf16>, vector<96x20xf32> -> vector<96x20xf32>
    %c0_5 = arith.constant 0 : index
    %c0_6 = arith.constant 0 : index
    %6 = vector.load %arg4[%c0_5, %c0_6] : memref<7x20xbf16, #tpu.memory_space<vmem>>, vector<7x20xbf16>
    %cst_7 = arith.constant dense<0.000000e+00> : vector<96x20xf32>
    %7 = tpu.matmul %3, %6, %cst_7 {dimension_numbers = #tpu.dot_dimension_numbers<[1], [0], [0], [1], [0, 0, 1, 1], [], []>} : vector<96x7xbf16>, vector<7x20xbf16>, vector<96x20xf32> -> vector<96x20xf32>
    %8 = arith.addf %5, %7 : vector<96x20xf32>
    %c0_8 = arith.constant 0 : index
    %c0_9 = arith.constant 0 : index
    %9 = vector.load %arg5[%c0_8, %c0_9] : memref<1x20xf32, #tpu.memory_space<vmem>>, vector<1x20xf32>
    %10 = vector.broadcast %9 : vector<1x20xf32> to vector<96x20xf32>
    %11 = arith.addf %8, %10 : vector<96x20xf32>
    %cst_10 = arith.constant 0.000000e+00 : f32
    %12 = vector.broadcast %cst_10 : f32 to vector<96x20xf32>
    %13 = arith.maximumf %11, %12 : vector<96x20xf32>
    %14 = arith.truncf %13 : vector<96x20xf32> to vector<96x20xbf16>
    %c0_11 = arith.constant 0 : index
    %c0_12 = arith.constant 0 : index
    %15 = vector.load %arg6[%c0_11, %c0_12] : memref<20x20xbf16, #tpu.memory_space<vmem>>, vector<20x20xbf16>
    %cst_13 = arith.constant dense<0.000000e+00> : vector<96x20xf32>
    %16 = tpu.matmul %14, %15, %cst_13 {dimension_numbers = #tpu.dot_dimension_numbers<[1], [0], [0], [1], [0, 0, 1, 1], [], []>} : vector<96x20xbf16>, vector<20x20xbf16>, vector<96x20xf32> -> vector<96x20xf32>
    %c0_14 = arith.constant 0 : index
    %c0_15 = arith.constant 0 : index
    %17 = vector.load %arg7[%c0_14, %c0_15] : memref<1x20xf32, #tpu.memory_space<vmem>>, vector<1x20xf32>
    %18 = vector.broadcast %17 : vector<1x20xf32> to vector<96x20xf32>
    %19 = arith.addf %16, %18 : vector<96x20xf32>
    %cst_16 = arith.constant 0.000000e+00 : f32
    %20 = vector.broadcast %cst_16 : f32 to vector<96x20xf32>
    %21 = arith.maximumf %19, %20 : vector<96x20xf32>
    %c0_17 = arith.constant 0 : index
    %c0_18 = arith.constant 0 : index
    %22 = vector.load %arg8[%c0_17, %c0_18] : memref<2x20xbf16, #tpu.memory_space<vmem>>, vector<2x20xbf16>
    %23 = arith.truncf %21 : vector<96x20xf32> to vector<96x20xbf16>
    %cst_19 = arith.constant dense<0.000000e+00> : vector<2x96xf32>
    %24 = tpu.matmul %22, %23, %cst_19 {dimension_numbers = #tpu.dot_dimension_numbers<[1], [1], [0], [0], [0, 0, 1, 0], [], []>} : vector<2x20xbf16>, vector<96x20xbf16>, vector<2x96xf32> -> vector<2x96xf32>
    %c0_20 = arith.constant 0 : index
    %c0_21 = arith.constant 0 : index
    %25 = vector.load %arg9[%c0_20, %c0_21] : memref<2x1xf32, #tpu.memory_space<vmem>>, vector<2x1xf32>
    %26 = vector.broadcast %25 : vector<2x1xf32> to vector<2x96xf32>
    %27 = arith.addf %24, %26 : vector<2x96xf32>
    %c0_22 = arith.constant 0 : index
    %c0_23 = arith.constant 0 : index
    %28 = vector.load %arg10[%c0_22, %c0_23] : memref<2x96xf32, #tpu.memory_space<vmem>>, vector<2x96xf32>
    tpu.vector_store %arg10[%c0_22, %c0_23], %27 {strides = array<i32>} : memref<2x96xf32, #tpu.memory_space<vmem>>, vector<2x96xf32>,
    return
  }
  func.func @transform_0(%arg0: i32) -> (i32, i32) {
    %c0_i32 = arith.constant 0 : i32
    %c0_i32_0 = arith.constant 0 : i32
    return %arg0, %c0_i32 : i32, i32
  }
  func.func @transform_1(%arg0: i32) -> (i32, i32) {
    %c0_i32 = arith.constant 0 : i32
    %c0_i32_0 = arith.constant 0 : i32
    return %arg0, %c0_i32 : i32, i32
  }
  func.func @transform_2(%arg0: i32) -> (i32, i32) {
    %c0_i32 = arith.constant 0 : i32
    %c0_i32_0 = arith.constant 0 : i32
    %c0_i32_1 = arith.constant 0 : i32
    return %c0_i32, %c0_i32_0 : i32, i32
  }
  func.func @transform_3(%arg0: i32) -> (i32, i32) {
    %c0_i32 = arith.constant 0 : i32
    %c0_i32_0 = arith.constant 0 : i32
    %c0_i32_1 = arith.constant 0 : i32
    return %c0_i32, %c0_i32_0 : i32, i32
  }
  func.func @transform_4(%arg0: i32) -> (i32, i32) {
    %c0_i32 = arith.constant 0 : i32
    %c0_i32_0 = arith.constant 0 : i32
    %c0_i32_1 = arith.constant 0 : i32
    return %c0_i32, %c0_i32_0 : i32, i32
  }
  func.func @transform_5(%arg0: i32) -> (i32, i32) {
    %c0_i32 = arith.constant 0 : i32
    %c0_i32_0 = arith.constant 0 : i32
    %c0_i32_1 = arith.constant 0 : i32
    return %c0_i32, %c0_i32_0 : i32, i32
  }
  func.func @transform_6(%arg0: i32) -> (i32, i32) {
    %c0_i32 = arith.constant 0 : i32
    %c0_i32_0 = arith.constant 0 : i32
    %c0_i32_1 = arith.constant 0 : i32
    return %c0_i32, %c0_i32_0 : i32, i32
  }
  func.func @transform_7(%arg0: i32) -> (i32, i32) {
    %c0_i32 = arith.constant 0 : i32
    %c0_i32_0 = arith.constant 0 : i32
    %c0_i32_1 = arith.constant 0 : i32
    return %c0_i32, %c0_i32_0 : i32, i32
  }
  func.func @transform_8(%arg0: i32) -> (i32, i32) {
    %c0_i32 = arith.constant 0 : i32
    %c0_i32_0 = arith.constant 0 : i32
    %c0_i32_1 = arith.constant 0 : i32
    return %c0_i32, %c0_i32_0 : i32, i32
  }
  func.func @transform_9(%arg0: i32) -> (i32, i32) {
    %c0_i32 = arith.constant 0 : i32
    %c0_i32_0 = arith.constant 0 : i32
    return %c0_i32, %arg0 : i32, i32
  }
}

</mosaic_0001>

<bundles_post_ra>
// kernel: critic_forward.1
= control target key start
LH: loop header
LB: loop body
LE: loop exit
PB: predicated region body
PF: predicated region fallthrough
CT: control target
= control target key end

     0   :  { %vm91_vm0 = vcmask 1042432   ;;  %vm92_vm1 = vcmask 1043456   ;;  %v412_v2 = vmov 65535   ;;  %vm143_vm2 = vcmask 130048   ;;  %s602_s2 = inlined_call_operand.vmem [shape: bf16[16,20], index: 2, kind: input, shape index: {}]   ;;  %s603_s3 = inlined_call_operand.vmem [shape: bf16[7,20], index: 3, kind: input, shape index: {}]   ;;  %s604_s0 = inlined_call_operand.vmem [shape: f32[96,16], index: 0, kind: input, shape index: {}]   ;;  %s605_s1 = inlined_call_operand.vmem [shape: f32[96,7], index: 1, kind: input, shape index: {}]   ;;  %s606_s4 = inlined_call_operand.vmem [shape: f32[1,20], index: 4, kind: input, shape index: {}]   ;;  %s607_s5 = inlined_call_operand.vmem [shape: bf16[20,20], index: 5, kind: input, shape index: {}]   ;;  %s608_s6 = inlined_call_operand.vmem [shape: f32[1,20], index: 6, kind: input, shape index: {}]   ;;  %s609_s8 = inlined_call_operand.vmem [shape: f32[2,1], index: 8, kind: input, shape index: {}]   ;;  %s610_s7 = inlined_call_operand.vmem [shape: bf16[2,20], index: 7, kind: input, shape index: {}]   ;;  %s611_s9 = inlined_call_operand.vmem [shape: f32[2,96], index: 9, kind: output, shape index: {}]  }
   0x1   :  { %v405_v0 = vld [vmem:[%s602_s2] sm:$0xff]  ;;  %v93_v3 = vsel %vm91_vm0, 4294967295, %v412_v2  ;;  %v34_v6 = vld [vmem:[%s604_s0 + $0x8] sm:$0xff]  ;;  %vm72_vm3 = vcmask 56320   ;;  %v35_v12 = vld [vmem:[%s604_s0 + $0x10] sm:$0xff]  ;;  %vm270_vm4 = vcmask 1041408  }
   0x2   :  { %v71_v1 = vld [vmem:[%s603_s3] sm:$0xf]  ;;  %v94_v5 = vsel %vm92_vm1, %v93_v3, 0  ;;  %v52_v8 = vld [vmem:[%s605_s1 + $0x8] sm:$0xff]  ;;  %169 = vmatpush.bf16.msra.mxu1 %v405_v0  ;;  %v36_v13 = vld [vmem:[%s604_s0 + $0x18] sm:$0xff]  ;;  %vm251_vm5 = vcmask 162816  }
   0x3   :  { %v33_v4 = vld [vmem:[%s604_s0] sm:$0xff]  ;;  %v96_v9 = vand.u32 %v94_v5, %v71_v1  ;;  %v53_v14 = vld [vmem:[%s605_s1 + $0x10] sm:$0xff]  ;;  %v54_v15 = vld [vmem:[%s605_s1 + $0x18] sm:$0xff]  ;;  %v46_v16 = vpack.c.bf16 %v36_v13, %v35_v12  ;;  %vm372_vm6 = vcmask 779264  }
   0x4   :  { %v51_v7 = vld [vmem:[%s605_s1] sm:$0xff]  ;;  %v45_v10 = vpack.c.bf16 %v34_v6, %v33_v4  ;;  %v64_v17 = vpack.c.bf16 %v54_v15, %v53_v14  ;;  %v38_v19 = vld [vmem:[%s604_s0 + $0x28] sm:$0xff]  ;;  %v39_v24 = vld [vmem:[%s604_s0 + $0x30] sm:$0xff] }
   0x5   :  { %v63_v11 = vpack.c.bf16 %v52_v8, %v51_v7  ;;  %105 = vmatpush.bf16.msra.mxu0 %v96_v9  ;;  %v37_v18 = vld [vmem:[%s604_s0 + $0x20] sm:$0xff]  ;;  %v56_v21 = vld [vmem:[%s605_s1 + $0x28] sm:$0xff]  ;;  %v40_v25 = vld [vmem:[%s604_s0 + $0x38] sm:$0xff] }
   0x6   :  { %388 = vmatmul.msk.bf16.vlgmr.msra.gmra.mxu1 %vm143_vm2, %v45_v10  ;;  %v55_v20 = vld [vmem:[%s605_s1 + $0x20] sm:$0xff]  ;;  %v47_v22 = vpack.c.bf16 %v38_v19, %v37_v18  ;;  %v57_v26 = vld [vmem:[%s605_s1 + $0x30] sm:$0xff]  ;;  %v58_v27 = vld [vmem:[%s605_s1 + $0x38] sm:$0xff]  ;;  %v48_v28 = vpack.c.bf16 %v40_v25, %v39_v24 }
   0x7   :  { %v65_v23 = vpack.c.bf16 %v56_v21, %v55_v20  ;;  %v66_v29 = vpack.c.bf16 %v58_v27, %v57_v26  ;;  %v41_v30 = vld [vmem:[%s604_s0 + $0x40] sm:$0xff]  ;;  %v42_v31 = vld [vmem:[%s604_s0 + $0x48] sm:$0xff]  ;;  %v43_v36 = vld [vmem:[%s604_s0 + $0x50] sm:$0xff] }
   0x8   :  { %378 = vmatmul.msk.bf16.vlgmr.msra.gmra.mxu0 %vm72_vm3, %v63_v11  ;;  %v59_v32 = vld [vmem:[%s605_s1 + $0x40] sm:$0xff]  ;;  %v60_v33 = vld [vmem:[%s605_s1 + $0x48] sm:$0xff]  ;;  %v49_v34 = vpack.c.bf16 %v42_v31, %v41_v30  ;;  %v44_v37 = vld [vmem:[%s604_s0 + $0x58] sm:$0xff] }
   0x9   :  { %v67_v35 = vpack.c.bf16 %v60_v33, %v59_v32  ;;  %v61_v38 = vld [vmem:[%s605_s1 + $0x50] sm:$0xff]  ;;  %v62_v39 = vld [vmem:[%s605_s1 + $0x58] sm:$0xff]  ;;  %v50_v40 = vpack.c.bf16 %v44_v37, %v43_v36  ;;  %v237_v42 = vld [vmem:[%s607_s5 + $0x8] sm:$0x3] }
   0xa   :  { %v68_v41 = vpack.c.bf16 %v62_v39, %v61_v38  ;;  %v247_v43 = vunpack.c.l.b16 %v237_v42  ;;  %v406_v46 = vld [vmem:[%s607_s5] sm:$0xff] }
   0xb   :  { %v563_v50 = vld [vmem:[%s606_s4] ss:$0 sm:$0xff] }
   0xc   :  { %v249_v44 = vpack.c.b16 %v247_v43, %v247_v43 }
   0xe   :  { %v272_v45 = vsel %vm270_vm4, %v249_v44, 0 }
   0xf   :  { %280 = vmatpush.bf16.msra.mxu2 %v272_v45 }
  0x13   :  { %281 = vmatpush.bf16.msra.mxu2 %v406_v46 }
  0x16   :  { %389 = vmatmul.msk.bf16.gmra.mxu1 %vm143_vm2, %v46_v16 }
  0x18   :  { %379 = vmatmul.msk.bf16.gmra.mxu0 %vm72_vm3, %v64_v17 }
  0x26   :  { %390 = vmatmul.msk.bf16.gmra.mxu1 %vm143_vm2, %v47_v22 }
  0x28   :  { %380 = vmatmul.msk.bf16.gmra.mxu0 %vm72_vm3, %v65_v23 }
  0x36   :  { %391 = vmatmul.msk.bf16.gmra.mxu1 %vm143_vm2, %v48_v28 }
  0x38   :  { %381 = vmatmul.msk.bf16.gmra.mxu0 %vm72_vm3, %v66_v29 }
  0x46   :  { %392 = vmatmul.msk.bf16.gmra.mxu1 %vm143_vm2, %v49_v34 }
  0x48   :  { %382 = vmatmul.msk.bf16.gmra.mxu0 %vm72_vm3, %v67_v35 }
  0x56   :  { %393 = vmatmul.msk.bf16.gmra.mxu1 %vm143_vm2, %v50_v40 }
  0x58   :  { %383 = vmatmul.msk.bf16.gmra.mxu0 %vm72_vm3, %v68_v41 }
  0x83   :  { %v171_v47 = vpop.f32.mrf.mxu1 }
  0x85   :  { %v107_v48 = vpop.f32.mrf.mxu0 }
  0x86   :  { %v172_v49 = vadd.f32 %v171_v47, %v107_v48 }
  0x88   :  { %v205_v53 = vadd.f32 %v563_v50, %v172_v49 }
  0x8a   :  { %v217_v56 = vmax.f32 %v205_v53, 0.0 }
  0x8b   :  { %v173_v51 = vpop.f32.mrf.mxu1 }
  0x8d   :  { %v109_v52 = vpop.f32.mrf.mxu0 }
  0x8e   :  { %v174_v54 = vadd.f32 %v173_v51, %v109_v52  ;;  %v411_v52 = vld [vmem:[%s608_s6] ss:$0 sm:$0xff] }
  0x90   :  { %v206_v55 = vadd.f32 %v563_v50, %v174_v54 }
  0x92   :  { %v218_v57 = vmax.f32 %v206_v55, 0.0 }
  0x93   :  { %v176_v58 = vpop.f32.mrf.mxu1 }
  0x94   :  { %v229_v59 = vpack.c.bf16 %v218_v57, %v217_v56 }
  0x95   :  { %v112_v60 = vpop.f32.mrf.mxu0 }
  0x96   :  { %398 = vmatmul.msk.bf16.vlgmr.msra.gmra.mxu2 %vm251_vm5, %v229_v59  ;;  %v177_v61 = vadd.f32 %v176_v58, %v112_v60 }
  0x98   :  { %v207_v0 = vadd.f32 %v563_v50, %v177_v61 }
  0x9a   :  { %v219_v3 = vmax.f32 %v207_v0, 0.0 }
  0x9b   :  { %v178_v62 = vpop.f32.mrf.mxu1 }
  0x9d   :  { %v114_v63 = vpop.f32.mrf.mxu0 }
  0x9e   :  { %v179_v1 = vadd.f32 %v178_v62, %v114_v63 }
  0xa0   :  { %v208_v2 = vadd.f32 %v563_v50, %v179_v1 }
  0xa2   :  { %v220_v4 = vmax.f32 %v208_v2, 0.0 }
  0xa3   :  { %v181_v5 = vpop.f32.mrf.mxu1 }
  0xa4   :  { %v230_v6 = vpack.c.bf16 %v220_v4, %v219_v3 }
  0xa5   :  { %v117_v7 = vpop.f32.mrf.mxu0 }
  0xa6   :  { %399 = vmatmul.msk.bf16.gmra.mxu2 %vm251_vm5, %v230_v6  ;;  %v182_v8 = vadd.f32 %v181_v5, %v117_v7 }
  0xa8   :  { %v209_v11 = vadd.f32 %v563_v50, %v182_v8 }
  0xaa   :  { %v221_v14 = vmax.f32 %v209_v11, 0.0 }
  0xab   :  { %v183_v9 = vpop.f32.mrf.mxu1 }
  0xad   :  { %v119_v10 = vpop.f32.mrf.mxu0 }
  0xae   :  { %v184_v12 = vadd.f32 %v183_v9, %v119_v10 }
  0xb0   :  { %v210_v13 = vadd.f32 %v563_v50, %v184_v12 }
  0xb2   :  { %v222_v15 = vmax.f32 %v210_v13, 0.0 }
  0xb3   :  { %v186_v16 = vpop.f32.mrf.mxu1 }
  0xb4   :  { %v231_v17 = vpack.c.bf16 %v222_v15, %v221_v14 }
  0xb5   :  { %v122_v18 = vpop.f32.mrf.mxu0 }
  0xb6   :  { %400 = vmatmul.msk.bf16.gmra.mxu2 %vm251_vm5, %v231_v17  ;;  %v187_v19 = vadd.f32 %v186_v16, %v122_v18 }
  0xb8   :  { %v211_v22 = vadd.f32 %v563_v50, %v187_v19 }
  0xba   :  { %v223_v25 = vmax.f32 %v211_v22, 0.0 }
  0xbb   :  { %v188_v20 = vpop.f32.mrf.mxu1 }
  0xbd   :  { %v124_v21 = vpop.f32.mrf.mxu0 }
  0xbe   :  { %v189_v23 = vadd.f32 %v188_v20, %v124_v21 }
  0xc0   :  { %v212_v24 = vadd.f32 %v563_v50, %v189_v23 }
  0xc2   :  { %v224_v26 = vmax.f32 %v212_v24, 0.0 }
  0xc3   :  { %v191_v27 = vpop.f32.mrf.mxu1 }
  0xc4   :  { %v232_v28 = vpack.c.bf16 %v224_v26, %v223_v25 }
  0xc5   :  { %v127_v29 = vpop.f32.mrf.mxu0 }
  0xc6   :  { %401 = vmatmul.msk.bf16.gmra.mxu2 %vm251_vm5, %v232_v28  ;;  %v192_v30 = vadd.f32 %v191_v27, %v127_v29 }
  0xc8   :  { %v213_v33 = vadd.f32 %v563_v50, %v192_v30 }
  0xca   :  { %v225_v36 = vmax.f32 %v213_v33, 0.0  ;;  %v413_v33 = vmov 0  }
  0xcb   :  { %v193_v31 = vpop.f32.mrf.mxu1  ;;  %409 = vset.pattern.permute.xlu0 %v413_v33 }
  0xcd   :  { %v129_v32 = vpop.f32.mrf.mxu0 }
  0xce   :  { %v194_v34 = vadd.f32 %v193_v31, %v129_v32  ;;  %v332_v32 = vld [vmem:[%s609_s8] sm:$0x3] }
  0xcf   :  { %335 = vperm.xlu0 %409, %v332_v32  }
  0xd0   :  { %v214_v35 = vadd.f32 %v563_v50, %v194_v34 }
  0xd2   :  { %v226_v37 = vmax.f32 %v214_v35, 0.0 }
  0xd3   :  { %v196_v38 = vpop.f32.mrf.mxu1 }
  0xd4   :  { %v233_v39 = vpack.c.bf16 %v226_v37, %v225_v36  ;;  %v325_v37 = vld [vmem:[%s610_s7] sm:$0x1] }
  0xd5   :  { %v132_v40 = vpop.f32.mrf.mxu0 }
  0xd6   :  { %402 = vmatmul.msk.bf16.gmra.mxu2 %vm251_vm5, %v233_v39  ;;  %v197_v41 = vadd.f32 %v196_v38, %v132_v40 }
  0xd8   :  { %v215_v44 = vadd.f32 %v563_v50, %v197_v41 }
  0xda   :  { %v227_v47 = vmax.f32 %v215_v44, 0.0 }
  0xdb   :  { %v198_v42 = vpop.f32.mrf.mxu1 }
  0xdd   :  { %v134_v43 = vpop.f32.mrf.mxu0 }
  0xde   :  { %v199_v45 = vadd.f32 %v198_v42, %v134_v43 }
  0xe0   :  { %v216_v46 = vadd.f32 %v563_v50, %v199_v45 }
  0xe2   :  { %v228_v48 = vmax.f32 %v216_v46, 0.0 }
  0xe4   :  { %v234_v49 = vpack.c.bf16 %v228_v48, %v227_v47 }
  0xe6   :  { %403 = vmatmul.msk.bf16.gmra.mxu2 %vm251_vm5, %v234_v49 }
 0x119   :  { %v283_v51 = vpop.f32.mrf.mxu2 }
 0x11a   :  { %v284_v53 = vadd.f32 %v411_v52, %v283_v51 }
 0x11c   :  { %v313_v56 = vmax.f32 %v284_v53, 0.0 }
 0x121   :  { %v285_v54 = vpop.f32.mrf.mxu2 }
 0x122   :  { %v286_v55 = vadd.f32 %v411_v52, %v285_v54 }
 0x124   :  { %v314_v57 = vmax.f32 %v286_v55, 0.0 }
 0x126   :  { %v326_v58 = vpack.c.bf16 %v314_v57, %v313_v56 }
 0x128   :  { %v342_v36 = vsel %vm251_vm5, %v326_v58, 0 }
 0x129   :  { %v288_v59 = vpop.f32.mrf.mxu2 }
 0x12a   :  { %v289_v60 = vadd.f32 %v411_v52, %v288_v59 }
 0x12c   :  { %v315_v62 = vmax.f32 %v289_v60, 0.0 }
 0x131   :  { %v290_v61 = vpop.f32.mrf.mxu2 }
 0x132   :  { %v291_v50 = vadd.f32 %v411_v52, %v290_v61 }
 0x134   :  { %v316_v63 = vmax.f32 %v291_v50, 0.0 }
 0x136   :  { %v327_v0 = vpack.c.bf16 %v316_v63, %v315_v62 }
 0x138   :  { %v345_v35 = vsel %vm251_vm5, %v327_v0, 0 }
 0x139   :  { %v293_v1 = vpop.f32.mrf.mxu2 }
 0x13a   :  { %v294_v2 = vadd.f32 %v411_v52, %v293_v1 }
 0x13c   :  { %v317_v5 = vmax.f32 %v294_v2, 0.0 }
 0x141   :  { %v295_v3 = vpop.f32.mrf.mxu2  ;;  %v336_v38 = vpop.permute.xlu0 %335 }
 0x142   :  { %v296_v4 = vadd.f32 %v411_v52, %v295_v3 }
 0x144   :  { %v318_v6 = vmax.f32 %v296_v4, 0.0 }
 0x146   :  { %v328_v7 = vpack.c.bf16 %v318_v6, %v317_v5 }
 0x148   :  { %v348_v34 = vsel %vm251_vm5, %v328_v7, 0 }
 0x149   :  { %v298_v8 = vpop.f32.mrf.mxu2 }
 0x14a   :  { %v299_v26 = vadd.f32 %v411_v52, %v298_v8 }
 0x14c   :  { %v319_v29 = vmax.f32 %v299_v26, 0.0 }
 0x151   :  { %v300_v9 = vpop.f32.mrf.mxu2 }
 0x152   :  { %v301_v24 = vadd.f32 %v411_v52, %v300_v9 }
 0x154   :  { %v320_v27 = vmax.f32 %v301_v24, 0.0 }
 0x156   :  { %v329_v30 = vpack.c.bf16 %v320_v27, %v319_v29 }
 0x158   :  { %v351_v31 = vsel %vm251_vm5, %v329_v30, 0 }
 0x159   :  { %v303_v10 = vpop.f32.mrf.mxu2 }
 0x15a   :  { %v304_v19 = vadd.f32 %v411_v52, %v303_v10 }
 0x15c   :  { %v321_v23 = vmax.f32 %v304_v19, 0.0 }
 0x161   :  { %v305_v11 = vpop.f32.mrf.mxu2 }
 0x162   :  { %v306_v16 = vadd.f32 %v411_v52, %v305_v11 }
 0x164   :  { %v322_v21 = vmax.f32 %v306_v16, 0.0 }
 0x166   :  { %v330_v25 = vpack.c.bf16 %v322_v21, %v321_v23 }
 0x168   :  { %v354_v28 = vsel %vm251_vm5, %v330_v25, 0 }
 0x169   :  { %v308_v12 = vpop.f32.mrf.mxu2 }
 0x16a   :  { %v309_v13 = vadd.f32 %v411_v52, %v308_v12 }
 0x16c   :  { %v323_v17 = vmax.f32 %v309_v13, 0.0 }
 0x171   :  { %v310_v14 = vpop.f32.mrf.mxu2 }
 0x172   :  { %v311_v15 = vadd.f32 %v411_v52, %v310_v14 }
 0x174   :  { %v324_v18 = vmax.f32 %v311_v15, 0.0 }
 0x176   :  { %v331_v20 = vpack.c.bf16 %v324_v18, %v323_v17 }
 0x178   :  { %v357_v22 = vsel %vm251_vm5, %v331_v20, 0 }
 0x179   :  { %361 = vmatpush.bf16.xpose.msra.mxu3 %v357_v22 }
 0x181   :  { %362 = vmatpush.bf16.xpose.msra.mxu3 %v354_v28 }
 0x189   :  { %363 = vmatpush.bf16.xpose.msra.mxu3 %v351_v31 }
 0x191   :  { %364 = vmatpush.bf16.xpose.msra.mxu3 %v348_v34 }
 0x199   :  { %365 = vmatpush.bf16.xpose.msra.mxu3 %v345_v35 }
 0x1a1   :  { %366 = vmatpush.bf16.xpose.msra.mxu3 %v342_v36 }
 0x1a8   :  { %404 = vmatmul.msk.bf16.vlgmr.msra.gmra.mxu3 %vm251_vm5, %v325_v37 }
 0x22b   :  { %v368_v39 = vpop.f32.mrf.mxu3 }
 0x22c   :  { %v369_v40 = vadd.f32 %v368_v39, %v336_v38 }
 0x22e   :  { %373 = vst.msk [vmem:[%s611_s9] sm:$0x3] %vm372_vm6, %v369_v40 }
 0x233   :  { %v370_v41 = vpop.f32.mrf.mxu3 }

</bundles_post_ra>
